<compile_context>
chip_gen: v6e
topology: v6e:2x2x1
jax: 0.10.0
libtpu: 0.0.40
codegen_flags: <defaults>
</compile_context>

<pallas_src>
import jax
import jax.numpy as jnp
from jax.experimental import pallas as pl
from jax.experimental.pallas import tpu as pltpu

IN_FEATURES = 2
HID1 = 32
HID2 = 16
HID3 = 1
PAD = 128          # lane-dense feature padding for weights / intermediates
MAX_TB = 128       # batch tile size once B grows past one tile


def w_discriminator_kernel(x_ref, misc_ref, w2_ref, out_ref):
    """Fused 3-layer MLP forward for one batch tile.

    x_ref    : (TB, 2)     f32  input latent tile
    misc_ref : (8, 128)    f32  packed small params:
                                rows 0-1 = w1 (2 x 32, zero-padded to 128)
                                row 2 = b1, row 3 = b2,
                                row 4 col 0 = b3 (scalar),
                                row 5 = w3 (16, zero-padded to 128)
    w2_ref   : (128, 128)  f32  w2 zero-padded
    out_ref  : (TB, 1)     f32  output tile (only the real column written)
    """
    x = x_ref[...].astype(jnp.float32)            # (TB, 2)
    misc = misc_ref[...]                          # (8, 128)

    w1_r0 = misc[0:1, :]                          # (1, 128)
    w1_r1 = misc[1:2, :]                          # (1, 128)
    b1 = misc[2:3, :]                             # (1, 128)
    b2 = misc[3:4, :]                             # (1, 128)
    b3 = misc[4:5, 0:1]                           # (1, 1) scalar bias
    w3 = misc[5:6, :]                             # (1, 128)

    # Layer 1: Linear(2 -> 32) as two VPU FMAs (K=2 is too small for the MXU).
    h = x[:, 0:1] * w1_r0 + x[:, 1:2] * w1_r1 + b1
    h = jnp.maximum(h, 0.0)                       # ReLU; padded cols stay 0

    # Layer 2: Linear(32 -> 16) on the MXU (one lane-dense 128x128 tile).
    h = jnp.dot(h, w2_ref[...], preferred_element_type=jnp.float32) + b2
    h = jnp.maximum(h, 0.0)                       # ReLU; padded cols stay 0

    # Layer 3: Linear(16 -> 1) as VPU multiply + XLU lane reduce (no MXU).
    out = jnp.sum(h * w3, axis=-1, keepdims=True) + b3
    out_ref[...] = out.astype(out_ref.dtype)


def pack_params(params):
    """Pack PyTorch-style params into two lane-dense operands.

    Call ONCE when parameters change; pass the results to the forward.
    """
    w1 = params["w1"]  # (2, 32)
    b1 = params["b1"]  # (32,)
    w2 = params["w2"]  # (32, 16)
    b2 = params["b2"]  # (16,)
    w3 = params["w3"]  # (16, 1)
    b3 = params["b3"]  # (1,)

    misc = jnp.zeros((8, PAD), jnp.float32)
    misc = misc.at[0:2, :HID1].set(w1)
    misc = misc.at[2, :HID1].set(b1)
    misc = misc.at[3, :HID2].set(b2)
    misc = misc.at[4, 0].set(b3[0])
    misc = misc.at[5, :HID2].set(w3[:, 0])

    w2p = jnp.zeros((PAD, PAD), jnp.float32)
    w2p = w2p.at[:HID1, :HID2].set(w2)
    return misc, w2p


def w_discriminator_forward(latent_rep, misc, w2p):
    """Forward matching w_discriminator.forward; returns (B, 1).

    `misc` / `w2p` come from pack_params() (pre-packed, hoisted out of the
    per-call path).
    """
    B = latent_rep.shape[0]
    x = latent_rep.astype(jnp.float32)

    # Pick the batch tile: single block while small, MAX_TB tiles when large.
    b8 = ((B + 7) // 8) * 8                       # sublane multiple
    tb = b8 if b8 <= MAX_TB else MAX_TB
    bp = ((B + tb - 1) // tb) * tb
    if bp != B:
        x = jnp.pad(x, ((0, bp - B), (0, 0)))

    out = pl.pallas_call(
        w_discriminator_kernel,
        out_shape=jax.ShapeDtypeStruct((bp, HID3), jnp.float32),
        grid=(bp // tb,),
        in_specs=[
            pl.BlockSpec((tb, IN_FEATURES), lambda i: (i, 0)),   # x tile
            pl.BlockSpec((8, PAD), lambda i: (0, 0)),            # misc (resident)
            pl.BlockSpec((PAD, PAD), lambda i: (0, 0)),          # w2 (resident)
        ],
        out_specs=pl.BlockSpec((tb, HID3), lambda i: (i, 0)),
        compiler_params=pltpu.CompilerParams(
            dimension_semantics=("parallel",)),
    )(x, misc, w2p)

    return out[:B]                                # (B, 1)


def init_params(key):
    """PyTorch nn.Linear-style init: U(-1/sqrt(fan_in), 1/sqrt(fan_in))."""
    sizes = [IN_FEATURES, HID1, HID2, HID3]       # 2 -> 32 -> 16 -> 1
    params = {}
    for i in range(3):
        fan_in, fan_out = sizes[i], sizes[i + 1]
        key, kw, kb = jax.random.split(key, 3)
        bound = 1.0 / jnp.sqrt(fan_in)
        # stored as [in, out] so the kernel computes x @ W + b
        params[f"w{i+1}"] = jax.random.uniform(
            kw, (fan_in, fan_out), jnp.float32, -bound, bound)
        params[f"b{i+1}"] = jax.random.uniform(
            kb, (fan_out,), jnp.float32, -bound, bound)
    return params


def reference_forward(latent_rep, params):
    """Pure-JAX reference of the PyTorch module (for validation)."""
    h = jnp.maximum(latent_rep @ params["w1"] + params["b1"], 0.0)
    h = jnp.maximum(h @ params["w2"] + params["b2"], 0.0)
    return h @ params["w3"] + params["b3"]


if __name__ == "__main__":
    key = jax.random.PRNGKey(0)
    key, kx = jax.random.split(key)

    B = 16                                        # small demo batch
    latent_rep = jax.random.normal(kx, (B, IN_FEATURES), jnp.float32)
    params = init_params(key)

    # Pack ONCE (hoisted out of the forward path per the perf review).
    misc, w2p = pack_params(params)
    misc, w2p = jax.block_until_ready((misc, w2p))

    out = w_discriminator_forward(latent_rep, misc, w2p)
    out = jax.block_until_ready(out)

    assert out.shape == (B, HID3)
    assert bool(jnp.all(jnp.isfinite(out)))

    ref = reference_forward(latent_rep, params)
    max_err = float(jnp.max(jnp.abs(out - ref)))
    assert max_err < 1e-3, f"mismatch vs reference: {max_err}"

    print("KERNEL_OK")
</pallas_src>

<mosaic_0001>
module attributes {stable_mosaic.version = 11 : i64} {
  func.func @w_discriminator_kernel(%arg0: i32, %arg1: memref<16x2xf32, #tpu.memory_space<vmem>>, %arg2: memref<8x128xf32, #tpu.memory_space<vmem>>, %arg3: memref<128x128xf32, #tpu.memory_space<vmem>>, %arg4: memref<16x1xf32, #tpu.memory_space<vmem>>) attributes {dimension_semantics = [#tpu.dimension_semantics<parallel>], iteration_bounds = array<i64: 1>, scalar_prefetch = 0 : i64, scratch_operands = 0 : i64, tpu.core_type = #tpu.core_type<tc>, window_params = [{transform_indices = @transform_0, window_bounds = array<i64: 16, 2>}, {pipeline_mode = #tpu.pipeline_mode<synchronous>, transform_indices = @transform_1, window_bounds = array<i64: 8, 128>}, {pipeline_mode = #tpu.pipeline_mode<synchronous>, transform_indices = @transform_2, window_bounds = array<i64: 128, 128>}, {transform_indices = @transform_3, window_bounds = array<i64: 16, 1>}]} {
    %c0 = arith.constant 0 : index
    %c0_0 = arith.constant 0 : index
    %0 = vector.load %arg1[%c0, %c0_0] : memref<16x2xf32, #tpu.memory_space<vmem>>, vector<16x2xf32>
    %c0_1 = arith.constant 0 : index
    %c0_2 = arith.constant 0 : index
    %1 = vector.load %arg2[%c0_1, %c0_2] : memref<8x128xf32, #tpu.memory_space<vmem>>, vector<8x128xf32>
    %2 = vector.extract_strided_slice %1 {offsets = [0, 0], sizes = [1, 128], strides = [1, 1]} : vector<8x128xf32> to vector<1x128xf32>
    %3 = vector.extract_strided_slice %1 {offsets = [1, 0], sizes = [1, 128], strides = [1, 1]} : vector<8x128xf32> to vector<1x128xf32>
    %4 = vector.extract_strided_slice %1 {offsets = [2, 0], sizes = [1, 128], strides = [1, 1]} : vector<8x128xf32> to vector<1x128xf32>
    %5 = vector.extract_strided_slice %1 {offsets = [3, 0], sizes = [1, 128], strides = [1, 1]} : vector<8x128xf32> to vector<1x128xf32>
    %6 = vector.extract_strided_slice %1 {offsets = [4, 0], sizes = [1, 1], strides = [1, 1]} : vector<8x128xf32> to vector<1x1xf32>
    %7 = vector.extract_strided_slice %1 {offsets = [5, 0], sizes = [1, 128], strides = [1, 1]} : vector<8x128xf32> to vector<1x128xf32>
    %8 = vector.extract_strided_slice %0 {offsets = [0, 0], sizes = [16, 1], strides = [1, 1]} : vector<16x2xf32> to vector<16x1xf32>
    %9 = vector.broadcast %8 : vector<16x1xf32> to vector<16x128xf32>
    %10 = vector.broadcast %2 : vector<1x128xf32> to vector<16x128xf32>
    %11 = arith.mulf %9, %10 : vector<16x128xf32>
    %12 = vector.extract_strided_slice %0 {offsets = [0, 1], sizes = [16, 1], strides = [1, 1]} : vector<16x2xf32> to vector<16x1xf32>
    %13 = vector.broadcast %12 : vector<16x1xf32> to vector<16x128xf32>
    %14 = vector.broadcast %3 : vector<1x128xf32> to vector<16x128xf32>
    %15 = arith.mulf %13, %14 : vector<16x128xf32>
    %16 = arith.addf %11, %15 : vector<16x128xf32>
    %17 = vector.broadcast %4 : vector<1x128xf32> to vector<16x128xf32>
    %18 = arith.addf %16, %17 : vector<16x128xf32>
    %cst = arith.constant 0.000000e+00 : f32
    %19 = vector.broadcast %cst : f32 to vector<16x128xf32>
    %20 = arith.maximumf %18, %19 : vector<16x128xf32>
    %c0_3 = arith.constant 0 : index
    %c0_4 = arith.constant 0 : index
    %21 = vector.load %arg3[%c0_3, %c0_4] : memref<128x128xf32, #tpu.memory_space<vmem>>, vector<128x128xf32>
    %cst_5 = arith.constant dense<0.000000e+00> : vector<16x128xf32>
    %22 = tpu.matmul %20, %21, %cst_5 {dimension_numbers = #tpu.dot_dimension_numbers<[1], [0], [0], [1], [0, 0, 1, 1], [], []>} : vector<16x128xf32>, vector<128x128xf32>, vector<16x128xf32> -> vector<16x128xf32>
    %23 = vector.broadcast %5 : vector<1x128xf32> to vector<16x128xf32>
    %24 = arith.addf %22, %23 : vector<16x128xf32>
    %cst_6 = arith.constant 0.000000e+00 : f32
    %25 = vector.broadcast %cst_6 : f32 to vector<16x128xf32>
    %26 = arith.maximumf %24, %25 : vector<16x128xf32>
    %27 = vector.broadcast %7 : vector<1x128xf32> to vector<16x128xf32>
    %28 = arith.mulf %26, %27 : vector<16x128xf32>
    %cst_7 = arith.constant dense<0.000000e+00> : vector<16xf32>
    %29 = vector.multi_reduction <add>, %28, %cst_7 [1] : vector<16x128xf32> to vector<16xf32>
    %30 = vector.shape_cast %29 : vector<16xf32> to vector<16x1xf32>
    %31 = vector.broadcast %6 : vector<1x1xf32> to vector<16x1xf32>
    %32 = arith.addf %30, %31 : vector<16x1xf32>
    %c0_8 = arith.constant 0 : index
    %c0_9 = arith.constant 0 : index
    %33 = vector.load %arg4[%c0_8, %c0_9] : memref<16x1xf32, #tpu.memory_space<vmem>>, vector<16x1xf32>
    tpu.vector_store %arg4[%c0_8, %c0_9], %32 {strides = array<i32>} : memref<16x1xf32, #tpu.memory_space<vmem>>, vector<16x1xf32>,
    return
  }
  func.func @transform_0(%arg0: i32) -> (i32, i32) {
    %c0_i32 = arith.constant 0 : i32
    %c0_i32_0 = arith.constant 0 : i32
    return %arg0, %c0_i32 : i32, i32
  }
  func.func @transform_1(%arg0: i32) -> (i32, i32) {
    %c0_i32 = arith.constant 0 : i32
    %c0_i32_0 = arith.constant 0 : i32
    %c0_i32_1 = arith.constant 0 : i32
    return %c0_i32, %c0_i32_0 : i32, i32
  }
  func.func @transform_2(%arg0: i32) -> (i32, i32) {
    %c0_i32 = arith.constant 0 : i32
    %c0_i32_0 = arith.constant 0 : i32
    %c0_i32_1 = arith.constant 0 : i32
    return %c0_i32, %c0_i32_0 : i32, i32
  }
  func.func @transform_3(%arg0: i32) -> (i32, i32) {
    %c0_i32 = arith.constant 0 : i32
    %c0_i32_0 = arith.constant 0 : i32
    return %arg0, %c0_i32 : i32, i32
  }
}

</mosaic_0001>

<bundles_post_ra>
// kernel: tpu_custom_call.1
= control target key start
LH: loop header
LB: loop body
LE: loop exit
PB: predicated region body
PF: predicated region fallthrough
CT: control target
= control target key end

     0   :  { %8 = vsyncpa [#allocation3], 0  ;;  %s276_s12 = smov [#allocation2]   ;;  %s319_s0 = inlined_call_operand.vmem [shape: f32[16,2], index: 0, kind: input, shape index: {}]   ;;  %s320_s1 = inlined_call_operand.vmem [shape: f32[8,128], index: 1, kind: input, shape index: {}]   ;;  %s321_s2 = inlined_call_operand.hbm [shape: f32[128,128], index: 2, kind: input, shape index: {}]   ;;  %s322_s3 = inlined_call_operand.vmem [shape: f32[16,1], index: 3, kind: output, shape index: {}]  }
   0x1   :  { %s18_s13 = sshll.u32 %s276_s12, 4  ;;  %s19_s13 = int_to_ptr.vmem [resolvable:$true] %s18_s13 }
   0x2   :  { %s262_s14 = scalar_lea.vmem %s19_s13, 2048  ;;  %p267_p1 = scmp.lt.s32.totalorder %s19_s13, %s19_s13 }
   0x3   :  { %p263_p0 = scmp.ne.s32.totalorder %s19_s13, %s262_s14  ;;  %p268_p2 = scmp.lt.s32.totalorder %s262_s14, %s262_s14 }
   0x5   :  { %p269_p3 = por %p268_p2, %p267_p1 }
   0x7   :  { %p270_p4 = pnand %p269_p3, %p263_p0 }
   0x9   :  { %273 = shalt.err (!%p270_p4)
}
   0xa   :  { %s277_s15 = smov 128   ;;  %s278_s16 = smov 8  }
   0xb   :  { %24 = dma.hbm_to_vmem [thread:$0]  %s321_s2, 2048, %s19_s13, [#allocation3], %s277_s15, %s277_s15, %s278_s16  }
   0xc   :  { %274 = dma.done.wait [#allocation3], 2048  }
   0xd   :  { %275 = vsyncadd [#allocation3], 4294965248  ;;  %v279_v0 = vmov 0   ;;  %v29_v1 = vld [vmem:[%s319_s0 + $0x8] sm:$0xff]  ;;  %v28_v2 = vld [vmem:[%s319_s0] sm:$0xff]  ;;  %v280_v5 = vmov 1   ;;  %v41_v20 = vlaneseq }
   0xe   :  { %252 = vset.pattern.permute.xlu1 %v279_v0  ;;  %250 = vset.pattern.permute.xlu0 %v279_v0  ;;  %v86_v3 = vld [vmem:[#allocation2 + $0x78] sm:$0xff]  ;;  %v85_v4 = vld [vmem:[#allocation2 + $0x70] sm:$0xff]  ;;  %v84_v6 = vld [vmem:[#allocation2 + $0x68] sm:$0xff]  ;;  %vm184_vm0 = vcmask 7168  }
   0xf   :  { %38 = vperm.xlu1 %252, %v29_v1   ;;  %33 = vperm.xlu0 %250, %v28_v2   ;;  %v83_v7 = vld [vmem:[#allocation2 + $0x60] sm:$0xff]  ;;  %v82_v8 = vld [vmem:[#allocation2 + $0x58] sm:$0xff]  ;;  %v81_v9 = vld [vmem:[#allocation2 + $0x50] sm:$0xff]  ;;  %v42_v21 = vshrl.u32 %v41_v20, 7 }
  0x10   :  { %210 = vmatprep.subr.mxu0 %v86_v3  ;;  %v80_v10 = vld [vmem:[#allocation2 + $0x48] sm:$0xff]  ;;  %v79_v11 = vld [vmem:[#allocation2 + $0x40] sm:$0xff]  ;;  %v78_v12 = vld [vmem:[#allocation2 + $0x38] sm:$0xff] }
  0x11   :  { %211 = vmatpush3.msra.mxu0 %v86_v3  ;;  %v77_v13 = vld [vmem:[#allocation2 + $0x30] sm:$0xff]  ;;  %v76_v14 = vld [vmem:[#allocation2 + $0x28] sm:$0xff]  ;;  %v75_v15 = vld [vmem:[#allocation2 + $0x20] sm:$0xff]  ;;  %v43_v22 = vsub.s32 0, %v42_v21  ;;  %v57_v23 = vsub.s32 1, %v42_v21  ;;  %v65_v27 = vsub.s32 2, %v42_v21 }
  0x12   :  { %212 = vmatprep.subr.mxu0 %v85_v4  ;;  %v74_v16 = vld [vmem:[#allocation2 + $0x18] sm:$0xff]  ;;  %v73_v17 = vld [vmem:[#allocation2 + $0x10] sm:$0xff]  ;;  %v72_v18 = vld [vmem:[#allocation2 + $0x8] sm:$0xff]  ;;  %v89_v43 = vsub.s32 3, %v42_v21  ;;  %v170_v45 = vsub.s32 5, %v42_v21  ;;  %v180_v55 = vsub.s32 4, %v42_v21 }
  0x13   :  { %253 = vset.pattern.permute.xlu1 %v280_v5  ;;  %251 = vset.pattern.permute.xlu0 %v280_v5  ;;  %v71_v19 = vld [vmem:[#allocation2] sm:$0xff] }
  0x14   :  { %52 = vperm.xlu1 %253, %v29_v1   ;;  %48 = vperm.xlu0 %251, %v28_v2   ;;  %v30_v24 = vld [vmem:[%s320_s1] sm:$0xff] }
  0x15   :  { %213 = vmatpush3.msra.mxu0 %v85_v4  ;;  %v44_v28 = vrot.slane %v30_v24, %v43_v22  ;;  %v58_v29 = vrot.slane %v30_v24, %v57_v23  ;;  %v66_v32 = vrot.slane %v30_v24, %v65_v27  ;;  %v90_v44 = vrot.slane %v30_v24, %v89_v43 }
  0x16   :  { %214 = vmatprep.subr.mxu0 %v84_v6  ;;  %v171_v48 = vrot.slane %v30_v24, %v170_v45  ;;  %v181_v56 = vrot.slane %v30_v24, %v180_v55 }
  0x17   :  { %215 = vmatpush3.msra.mxu0 %v84_v6 }
  0x18   :  { %216 = vmatprep.subr.mxu0 %v83_v7 }
  0x19   :  { %217 = vmatpush3.msra.mxu0 %v83_v7 }
  0x1a   :  { %218 = vmatprep.subr.mxu0 %v82_v8 }
  0x1b   :  { %219 = vmatpush3.msra.mxu0 %v82_v8 }
  0x1c   :  { %220 = vmatprep.subr.mxu0 %v81_v9 }
  0x1d   :  { %221 = vmatpush3.msra.mxu0 %v81_v9 }
  0x1e   :  { %222 = vmatprep.subr.mxu0 %v80_v10 }
  0x1f   :  { %223 = vmatpush3.msra.mxu0 %v80_v10 }
  0x20   :  { %224 = vmatprep.subr.mxu0 %v79_v11 }
  0x21   :  { %225 = vmatpush3.msra.mxu0 %v79_v11 }
  0x22   :  { %226 = vmatprep.subr.mxu0 %v78_v12 }
  0x23   :  { %227 = vmatpush3.msra.mxu0 %v78_v12 }
  0x24   :  { %228 = vmatprep.subr.mxu0 %v77_v13 }
  0x25   :  { %229 = vmatpush3.msra.mxu0 %v77_v13 }
  0x26   :  { %230 = vmatprep.subr.mxu0 %v76_v14 }
  0x27   :  { %231 = vmatpush3.msra.mxu0 %v76_v14 }
  0x28   :  { %232 = vmatprep.subr.mxu0 %v75_v15 }
  0x29   :  { %233 = vmatpush3.msra.mxu0 %v75_v15 }
  0x2a   :  { %234 = vmatprep.subr.mxu0 %v74_v16 }
  0x2b   :  { %235 = vmatpush3.msra.mxu0 %v74_v16 }
  0x2c   :  { %236 = vmatprep.subr.mxu0 %v73_v17 }
  0x2d   :  { %237 = vmatpush3.msra.mxu0 %v73_v17 }
  0x2e   :  { %238 = vmatprep.subr.mxu0 %v72_v18 }
  0x2f   :  { %239 = vmatpush3.msra.mxu0 %v72_v18 }
  0x30   :  { %240 = vmatprep.subr.mxu0 %v71_v19 }
  0x31   :  { %241 = vmatpush3.msra.mxu0 %v71_v19 }
  0x8a   :  { %v34_v25 = vpop.permute.xlu0 %33  ;;  %v39_v26 = vpop.permute.xlu1 %38 }
  0x8b   :  { %v45_v33 = vmul.f32 %v44_v28, %v34_v25  ;;  %v46_v34 = vmul.f32 %v44_v28, %v39_v26 }
  0x8f   :  { %v53_v30 = vpop.permute.xlu1 %52  ;;  %v49_v31 = vpop.permute.xlu0 %48 }
  0x90   :  { %v60_v35 = vmul.f32 %v58_v29, %v53_v30  ;;  %v59_v36 = vmul.f32 %v58_v29, %v49_v31 }
  0x92   :  { %v62_v37 = vadd.f32 %v60_v35, %v46_v34  ;;  %v61_v38 = vadd.f32 %v59_v36, %v45_v33 }
  0x94   :  { %v67_v39 = vadd.f32 %v66_v32, %v61_v38  ;;  %v68_v40 = vadd.f32 %v66_v32, %v62_v37 }
  0x96   :  { %v69_v41 = vmax.f32 %v67_v39, 0.0  ;;  %v70_v42 = vmax.f32 %v68_v40, 0.0 }
  0x98   :  { %242 = vmatprep.mubr.f32.mxu0 %v69_v41 }
  0x99   :  { %243 = vmatmul.mubr.f32.vlgmr.msra.gmra.mxu0 %v70_v42 }
 0x159   :  { %v244_v46 = vpop.f32.mrf.mxu0 }
 0x15a   :  { %v163_v47 = vadd.f32 %v244_v46, %v90_v44 }
 0x15b   :  { %v157_v49 = vpop.f32.mrf.mxu0 }
 0x15c   :  { %v167_v50 = vmax.f32 %v163_v47, 0.0  ;;  %v158_v51 = vadd.f32 %v157_v49, %v90_v44 }
 0x15e   :  { %v166_v52 = vmax.f32 %v158_v51, 0.0  ;;  %v173_v53 = vmul.f32 %v171_v48, %v167_v50 }
 0x160   :  { %176 = vadd.xlane.f32.xlu0 %v173_v53  ;;  %v172_v54 = vmul.f32 %v171_v48, %v166_v52 }
 0x162   :  { %174 = vadd.xlane.f32.xlu1 %v172_v54 }
 0x1e9   :  { %v177_v57 = vpop.xlane.xlu0 %176 }
 0x1ea   :  { %v183_v58 = vadd.f32 %v181_v56, %v177_v57 }
 0x1eb   :  { %v175_v59 = vpop.xlane.xlu1 %174 }
 0x1ec   :  { %186 = vst.msk [vmem:[%s322_s3 + $0x8] sm:$0xff] %vm184_vm0, %v183_v58  ;;  %v182_v60 = vadd.f32 %v181_v56, %v175_v59 }
 0x1ee   :  { %185 = vst.msk [vmem:[%s322_s3] sm:$0xff] %vm184_vm0, %v182_v60 }
 0x1ef   :  { %191 = vsyncpa [#allocation3], 1 }

</bundles_post_ra>
